<compile_context>
chip_gen: v7x
topology: tpu7x:2x2x1
jax: 0.10.0
libtpu: 0.0.40
codegen_flags: <defaults>
</compile_context>

<pallas_src>
import functools

import jax
import jax.numpy as jnp
from jax.experimental import pallas as pl
from jax.experimental.pallas import tpu as pltpu

_LN_EPS = 1e-5                      # nn.LayerNorm default
_VMEM_LIMIT = 48 * 1024 * 1024      # headroom below v7x's 64 MiB physical VMEM


def _layernorm(x, g, b):
    mu = jnp.mean(x, axis=-1, keepdims=True)
    var = jnp.mean(jnp.square(x - mu), axis=-1, keepdims=True)
    return (x - mu) * jax.lax.rsqrt(var + _LN_EPS) * g + b


def _pick_row_tile(rows):
    for t in (512, 256, 128, 64, 32, 16, 8):
        if rows % t == 0:
            return t
    return rows                     # full extent (always legal)


def _pick_n_tile(nh):
    for t in (1024, 512, 256, 128):
        if nh % t == 0:
            return t
    return nh


# --------------- kernel 1: LN1 + fused QKV projection (row-tiled) -------------

def qkv_proj_kernel(x_ref, g_ref, b_ref, w_ref, o_ref):
    h = _layernorm(x_ref[...], g_ref[...], b_ref[...]).astype(jnp.bfloat16)
    o_ref[...] = jnp.dot(h, w_ref[...],
                         preferred_element_type=jnp.float32).astype(jnp.bfloat16)


def qkv_proj(x2, g, b, w):
    rows, d = x2.shape
    d3 = w.shape[1]
    R = _pick_row_tile(rows)
    return pl.pallas_call(
        qkv_proj_kernel,
        out_shape=jax.ShapeDtypeStruct((rows, d3), jnp.bfloat16),
        grid=(rows // R,),
        in_specs=[
            pl.BlockSpec((R, d), lambda i: (i, 0)),       # activation row tile
            pl.BlockSpec((1, d), lambda i: (0, 0)),       # ln1 gamma
            pl.BlockSpec((1, d), lambda i: (0, 0)),       # ln1 beta
            pl.BlockSpec((d, d3), lambda i: (0, 0)),      # Wqkv (resident)
        ],
        out_specs=pl.BlockSpec((R, d3), lambda i: (i, 0)),
        compiler_params=pltpu.CompilerParams(
            dimension_semantics=("parallel",),
            vmem_limit_bytes=_VMEM_LIMIT),
    )(x2, g, b, w)


# --------------- kernel 2: per-(batch, head) attention core -------------------

def attn_core_kernel(q_ref, k_ref, v_ref, o_ref, *, scale):
    q = q_ref[0]                                       # (T, dh) bf16
    k = k_ref[0]
    v = v_ref[0]
    # scores = q @ k^T (contract last dims), f32 accumulation
    s = jax.lax.dot_general(q, k, (((1,), (1,)), ((), ())),
                            preferred_element_type=jnp.float32) * scale
    s = s - jnp.max(s, axis=-1, keepdims=True)
    p = jnp.exp(s)
    p = p * pl.reciprocal(jnp.sum(p, axis=-1, keepdims=True), approx=True)
    ctx = jnp.dot(p.astype(jnp.bfloat16), v, preferred_element_type=jnp.float32)
    o_ref[0] = ctx.astype(jnp.bfloat16)
    # TODO(synk): for very long sequences (T >> 512) switch to flash-style
    # KV streaming with online softmax instead of full (T, T) scores.


def attn_core(q, k, v, scale):
    BH, T, dh = q.shape
    spec = pl.BlockSpec((1, T, dh), lambda i: (i, 0, 0))
    return pl.pallas_call(
        functools.partial(attn_core_kernel, scale=scale),
        out_shape=jax.ShapeDtypeStruct((BH, T, dh), jnp.bfloat16),
        grid=(BH,),
        in_specs=[spec, spec, spec],
        out_specs=spec,
        compiler_params=pltpu.CompilerParams(
            dimension_semantics=("parallel",),
            vmem_limit_bytes=_VMEM_LIMIT),
    )(q, k, v)


# --------- kernel 3: Wo projection + residual + LN2 + tiled/fused MLP ---------

def attn_out_mlp_kernel(x_ref, ctx_ref, wo_ref, g_ref, b_ref, w1_ref, w2_ref,
                        o_ref, xnew_scr, h_scr, acc_scr):
    n = pl.program_id(1)

    @pl.when(n == 0)
    def _():
        attn = jnp.dot(ctx_ref[...], wo_ref[...],
                       preferred_element_type=jnp.float32)
        xnew = x_ref[...] + attn
        xnew_scr[...] = xnew
        h_scr[...] = _layernorm(xnew, g_ref[...], b_ref[...]).astype(jnp.bfloat16)
        acc_scr[...] = jnp.zeros_like(acc_scr)

    m = jnp.dot(h_scr[...], w1_ref[...], preferred_element_type=jnp.float32)
    # TODO(synk): PyTorch nn.GELU defaults to the exact erf form; tanh approx kept.
    m = jax.nn.gelu(m, approximate=True)
    acc_scr[...] += jnp.dot(m.astype(jnp.bfloat16), w2_ref[...],
                            preferred_element_type=jnp.float32)

    @pl.when(n == pl.num_programs(1) - 1)
    def _():
        o_ref[...] = xnew_scr[...] + acc_scr[...]


def attn_out_mlp(x2, ctx2, p):
    rows, d = x2.shape
    NH = p['w1'].shape[1]
    R = _pick_row_tile(rows)
    TN = _pick_n_tile(NH)
    return pl.pallas_call(
        attn_out_mlp_kernel,
        out_shape=jax.ShapeDtypeStruct((rows, d), jnp.float32),
        grid=(rows // R, NH // TN),
        in_specs=[
            pl.BlockSpec((R, d), lambda i, n: (i, 0)),     # residual stream tile
            pl.BlockSpec((R, d), lambda i, n: (i, 0)),     # attention ctx tile
            pl.BlockSpec((d, d), lambda i, n: (0, 0)),     # Wo (resident)
            pl.BlockSpec((1, d), lambda i, n: (0, 0)),     # ln2 gamma
            pl.BlockSpec((1, d), lambda i, n: (0, 0)),     # ln2 beta
            pl.BlockSpec((d, TN), lambda i, n: (0, n)),    # W1 column tile
            pl.BlockSpec((TN, d), lambda i, n: (n, 0)),    # W2 row tile
        ],
        out_specs=pl.BlockSpec((R, d), lambda i, n: (i, 0)),
        scratch_shapes=[
            pltpu.VMEM((R, d), jnp.float32),    # x + attn (post-attention residual)
            pltpu.VMEM((R, d), jnp.bfloat16),   # LN2 activation
            pltpu.VMEM((R, d), jnp.float32),    # MLP accumulator
        ],
        compiler_params=pltpu.CompilerParams(
            dimension_semantics=("parallel", "arbitrary"),
            vmem_limit_bytes=_VMEM_LIMIT),
    )(x2, ctx2, p['wo'], p['ln2_g'], p['ln2_b'], p['w1'], p['w2'])


# --------------- kernel 4: final LayerNorm (CLS only) + class head ------------

def head_kernel(x_ref, g_ref, b_ref, w_ref, o_ref):
    h = _layernorm(x_ref[...], g_ref[...], b_ref[...]).astype(jnp.bfloat16)
    o_ref[...] = jnp.dot(h, w_ref[...], preferred_element_type=jnp.float32)


def cls_head(x_cls, params):
    B, d = x_cls.shape
    w = params['head_w']
    C = w.shape[1]
    Cp = ((C + 127) // 128) * 128              # lane-dense output; slice after
    if Cp != C:
        w = jnp.pad(w, ((0, 0), (0, Cp - C)))
    vmem = pl.BlockSpec(memory_space=pltpu.MemorySpace.VMEM)
    out = pl.pallas_call(
        head_kernel,
        out_shape=jax.ShapeDtypeStruct((B, Cp), jnp.float32),
        in_specs=[vmem] * 4,
        out_specs=vmem,
        compiler_params=pltpu.CompilerParams(vmem_limit_bytes=_VMEM_LIMIT),
    )(x_cls, params['lnf_g'], params['lnf_b'], w)
    return out[:, :C]


# ------------------------------- model glue -----------------------------------

def transformer_block(x2, p, B, T, H):
    rows, d = x2.shape
    dh = d // H
    qkv = qkv_proj(x2, p['ln1_g'], p['ln1_b'], p['wqkv'])          # (rows, 3d) bf16
    # Head split (once, in XLA) -> (3, B*H, T, dh)
    qkv = qkv.reshape(B, T, 3, H, dh).transpose(2, 0, 3, 1, 4)
    qkv = qkv.reshape(3, B * H, T, dh)
    ctx = attn_core(qkv[0], qkv[1], qkv[2], 1.0 / (dh ** 0.5))     # (B*H, T, dh)
    # Head merge (once, in XLA) -> (rows, d)
    ctx2 = ctx.reshape(B, H, T, dh).transpose(0, 2, 1, 3).reshape(rows, d)
    return attn_out_mlp(x2, ctx2, p)


def bert_forward(idx, params, H):
    B, T = idx.shape
    d = params['wte'].shape[1]
    tok_emb = jnp.take(params['wte'], idx, axis=0)        # (B, T, d) gather (glue)
    pos_emb = params['wpe'][:T][None, :, :]               # (1, T, d)
    x = tok_emb + pos_emb                                 # dropout == identity (eval)
    x2 = x.reshape(B * T, d)
    for p in params['blocks']:
        x2 = transformer_block(x2, p, B, T, H)
    x_cls = x2.reshape(B, T, d)[:, 0, :]                  # CLS token only
    return cls_head(x_cls, params)                        # (B, C)


def init_params(key, d, H, T, V, C, layers):
    def nrm(k, shape, dtype=jnp.bfloat16, scale=0.02):
        return (scale * jax.random.normal(k, shape, dtype=jnp.float32)).astype(dtype)

    keys = jax.random.split(key, 3 + layers)
    params = {
        'wte': nrm(keys[0], (V, d), jnp.float32),
        'wpe': nrm(keys[1], (T, d), jnp.float32),
        'lnf_g': jnp.ones((1, d), jnp.float32),
        'lnf_b': jnp.zeros((1, d), jnp.float32),
        'head_w': nrm(keys[2], (d, C)),                   # bf16, bias=False
        'blocks': [],
    }
    for l in range(layers):
        bk = jax.random.split(keys[3 + l], 4)
        params['blocks'].append({
            'ln1_g': jnp.ones((1, d), jnp.float32),
            'ln1_b': jnp.zeros((1, d), jnp.float32),
            'wqkv': nrm(bk[0], (d, 3 * d)),               # fused QKV, bias=False
            'wo':   nrm(bk[1], (d, d)),
            'ln2_g': jnp.ones((1, d), jnp.float32),
            'ln2_b': jnp.zeros((1, d), jnp.float32),
            'w1':   nrm(bk[2], (d, 4 * d)),               # MLP expand
            'w2':   nrm(bk[3], (4 * d, d)),               # MLP project
        })
    return params


if __name__ == "__main__":
    d, H, T, V, C, layers = 32, 4, 8, 64, 4, 2
    B = 2
    key = jax.random.PRNGKey(0)
    pkey, ikey = jax.random.split(key)
    params = init_params(pkey, d, H, T, V, C, layers)
    idx = jax.random.randint(ikey, (B, T), 0, V, dtype=jnp.int32)

    fwd = jax.jit(functools.partial(bert_forward, H=H))
    logits = fwd(idx, params)
    jax.block_until_ready(logits)
    assert logits.shape == (B, C) and logits.dtype == jnp.float32
    print("KERNEL_OK")
</pallas_src>

<mosaic_0001>
module attributes {stable_mosaic.version = 11 : i64} {
  func.func @qkv_proj_kernel(%arg0: i32, %arg1: memref<16x32xf32, #tpu.memory_space<vmem>>, %arg2: memref<1x32xf32, #tpu.memory_space<vmem>>, %arg3: memref<1x32xf32, #tpu.memory_space<vmem>>, %arg4: memref<32x96xbf16, #tpu.memory_space<vmem>>, %arg5: memref<16x96xbf16, #tpu.memory_space<vmem>>) attributes {dimension_semantics = [#tpu.dimension_semantics<parallel>], iteration_bounds = array<i64: 1>, scalar_prefetch = 0 : i64, scratch_operands = 0 : i64, tpu.core_type = #tpu.core_type<tc>, window_params = [{transform_indices = @transform_0, window_bounds = array<i64: 16, 32>}, {pipeline_mode = #tpu.pipeline_mode<synchronous>, transform_indices = @transform_1, window_bounds = array<i64: 1, 32>}, {pipeline_mode = #tpu.pipeline_mode<synchronous>, transform_indices = @transform_2, window_bounds = array<i64: 1, 32>}, {pipeline_mode = #tpu.pipeline_mode<synchronous>, transform_indices = @transform_3, window_bounds = array<i64: 32, 96>}, {transform_indices = @transform_4, window_bounds = array<i64: 16, 96>}]} {
    %c0 = arith.constant 0 : index
    %c0_0 = arith.constant 0 : index
    %0 = vector.load %arg1[%c0, %c0_0] : memref<16x32xf32, #tpu.memory_space<vmem>>, vector<16x32xf32>
    %c0_1 = arith.constant 0 : index
    %c0_2 = arith.constant 0 : index
    %1 = vector.load %arg2[%c0_1, %c0_2] : memref<1x32xf32, #tpu.memory_space<vmem>>, vector<1x32xf32>
    %c0_3 = arith.constant 0 : index
    %c0_4 = arith.constant 0 : index
    %2 = vector.load %arg3[%c0_3, %c0_4] : memref<1x32xf32, #tpu.memory_space<vmem>>, vector<1x32xf32>
    %cst = arith.constant dense<0.000000e+00> : vector<16xf32>
    %3 = vector.multi_reduction <add>, %0, %cst [1] : vector<16x32xf32> to vector<16xf32>
    %4 = vector.shape_cast %3 : vector<16xf32> to vector<16x1xf32>
    %cst_5 = arith.constant 3.200000e+01 : f32
    %5 = vector.broadcast %cst_5 : f32 to vector<16x1xf32>
    %6 = arith.divf %4, %5 : vector<16x1xf32>
    %7 = vector.broadcast %6 : vector<16x1xf32> to vector<16x32xf32>
    %8 = arith.subf %0, %7 : vector<16x32xf32>
    %9 = arith.mulf %8, %8 : vector<16x32xf32>
    %cst_6 = arith.constant dense<0.000000e+00> : vector<16xf32>
    %10 = vector.multi_reduction <add>, %9, %cst_6 [1] : vector<16x32xf32> to vector<16xf32>
    %11 = vector.shape_cast %10 : vector<16xf32> to vector<16x1xf32>
    %cst_7 = arith.constant 3.200000e+01 : f32
    %12 = vector.broadcast %cst_7 : f32 to vector<16x1xf32>
    %13 = arith.divf %11, %12 : vector<16x1xf32>
    %14 = vector.broadcast %6 : vector<16x1xf32> to vector<16x32xf32>
    %15 = arith.subf %0, %14 : vector<16x32xf32>
    %cst_8 = arith.constant 9.99999974E-6 : f32
    %16 = vector.broadcast %cst_8 : f32 to vector<16x1xf32>
    %17 = arith.addf %13, %16 : vector<16x1xf32>
    %18 = math.rsqrt %17 : vector<16x1xf32>
    %19 = vector.broadcast %18 : vector<16x1xf32> to vector<16x32xf32>
    %20 = arith.mulf %15, %19 : vector<16x32xf32>
    %21 = vector.broadcast %1 : vector<1x32xf32> to vector<16x32xf32>
    %22 = arith.mulf %20, %21 : vector<16x32xf32>
    %23 = vector.broadcast %2 : vector<1x32xf32> to vector<16x32xf32>
    %24 = arith.addf %22, %23 : vector<16x32xf32>
    %25 = arith.truncf %24 : vector<16x32xf32> to vector<16x32xbf16>
    %c0_9 = arith.constant 0 : index
    %c0_10 = arith.constant 0 : index
    %26 = vector.load %arg4[%c0_9, %c0_10] : memref<32x96xbf16, #tpu.memory_space<vmem>>, vector<32x96xbf16>
    %cst_11 = arith.constant dense<0.000000e+00> : vector<16x96xf32>
    %27 = tpu.matmul %25, %26, %cst_11 {dimension_numbers = #tpu.dot_dimension_numbers<[1], [0], [0], [1], [0, 0, 1, 1], [], []>} : vector<16x32xbf16>, vector<32x96xbf16>, vector<16x96xf32> -> vector<16x96xf32>
    %28 = arith.truncf %27 : vector<16x96xf32> to vector<16x96xbf16>
    %c0_12 = arith.constant 0 : index
    %c0_13 = arith.constant 0 : index
    %29 = vector.load %arg5[%c0_12, %c0_13] : memref<16x96xbf16, #tpu.memory_space<vmem>>, vector<16x96xbf16>
    tpu.vector_store %arg5[%c0_12, %c0_13], %28 {strides = array<i32>} : memref<16x96xbf16, #tpu.memory_space<vmem>>, vector<16x96xbf16>,
    return
  }
  func.func @transform_0(%arg0: i32) -> (i32, i32) {
    %c0_i32 = arith.constant 0 : i32
    %c0_i32_0 = arith.constant 0 : i32
    return %arg0, %c0_i32 : i32, i32
  }
  func.func @transform_1(%arg0: i32) -> (i32, i32) {
    %c0_i32 = arith.constant 0 : i32
    %c0_i32_0 = arith.constant 0 : i32
    %c0_i32_1 = arith.constant 0 : i32
    return %c0_i32, %c0_i32_0 : i32, i32
  }
  func.func @transform_2(%arg0: i32) -> (i32, i32) {
    %c0_i32 = arith.constant 0 : i32
    %c0_i32_0 = arith.constant 0 : i32
    %c0_i32_1 = arith.constant 0 : i32
    return %c0_i32, %c0_i32_0 : i32, i32
  }
  func.func @transform_3(%arg0: i32) -> (i32, i32) {
    %c0_i32 = arith.constant 0 : i32
    %c0_i32_0 = arith.constant 0 : i32
    %c0_i32_1 = arith.constant 0 : i32
    return %c0_i32, %c0_i32_0 : i32, i32
  }
  func.func @transform_4(%arg0: i32) -> (i32, i32) {
    %c0_i32 = arith.constant 0 : i32
    %c0_i32_0 = arith.constant 0 : i32
    return %arg0, %c0_i32 : i32, i32
  }
}

module attributes {stable_mosaic.version = 11 : i64} {
  func.func @attn_core_kernel(%arg0: i32, %arg1: memref<1x8x8xbf16, #tpu.memory_space<vmem>>, %arg2: memref<1x8x8xbf16, #tpu.memory_space<vmem>>, %arg3: memref<1x8x8xbf16, #tpu.memory_space<vmem>>, %arg4: memref<1x8x8xbf16, #tpu.memory_space<vmem>>) attributes {dimension_semantics = [#tpu.dimension_semantics<parallel>], iteration_bounds = array<i64: 8>, scalar_prefetch = 0 : i64, scratch_operands = 0 : i64, tpu.core_type = #tpu.core_type<tc>, window_params = [{transform_indices = @transform_0, window_bounds = array<i64: 1, 8, 8>}, {transform_indices = @transform_1, window_bounds = array<i64: 1, 8, 8>}, {transform_indices = @transform_2, window_bounds = array<i64: 1, 8, 8>}, {transform_indices = @transform_3, window_bounds = array<i64: 1, 8, 8>}]} {
    %c0 = arith.constant 0 : index
    %c0_0 = arith.constant 0 : index
    %c0_1 = arith.constant 0 : index
    %0 = vector.load %arg1[%c0, %c0_0, %c0_1] : memref<1x8x8xbf16, #tpu.memory_space<vmem>>, vector<1x8x8xbf16>
    %1 = vector.shape_cast %0 : vector<1x8x8xbf16> to vector<8x8xbf16>
    %c0_2 = arith.constant 0 : index
    %c0_3 = arith.constant 0 : index
    %c0_4 = arith.constant 0 : index
    %2 = vector.load %arg2[%c0_2, %c0_3, %c0_4] : memref<1x8x8xbf16, #tpu.memory_space<vmem>>, vector<1x8x8xbf16>
    %3 = vector.shape_cast %2 : vector<1x8x8xbf16> to vector<8x8xbf16>
    %c0_5 = arith.constant 0 : index
    %c0_6 = arith.constant 0 : index
    %c0_7 = arith.constant 0 : index
    %4 = vector.load %arg3[%c0_5, %c0_6, %c0_7] : memref<1x8x8xbf16, #tpu.memory_space<vmem>>, vector<1x8x8xbf16>
    %5 = vector.shape_cast %4 : vector<1x8x8xbf16> to vector<8x8xbf16>
    %cst = arith.constant dense<0.000000e+00> : vector<8x8xf32>
    %6 = tpu.matmul %1, %3, %cst {dimension_numbers = #tpu.dot_dimension_numbers<[1], [1], [0], [0], [0, 0, 1, 0], [], []>} : vector<8x8xbf16>, vector<8x8xbf16>, vector<8x8xf32> -> vector<8x8xf32>
    %cst_8 = arith.constant 0.353553385 : f32
    %7 = vector.broadcast %cst_8 : f32 to vector<8x8xf32>
    %8 = arith.mulf %6, %7 : vector<8x8xf32>
    %cst_9 = arith.constant dense<0xFF800000> : vector<8xf32>
    %9 = vector.multi_reduction <maximumf>, %8, %cst_9 [1] : vector<8x8xf32> to vector<8xf32>
    %10 = vector.shape_cast %9 : vector<8xf32> to vector<8x1xf32>
    %11 = vector.broadcast %10 : vector<8x1xf32> to vector<8x8xf32>
    %12 = arith.subf %8, %11 : vector<8x8xf32>
    %13 = math.exp %12 : vector<8x8xf32>
    %cst_10 = arith.constant dense<0.000000e+00> : vector<8xf32>
    %14 = vector.multi_reduction <add>, %13, %cst_10 [1] : vector<8x8xf32> to vector<8xf32>
    %15 = vector.shape_cast %14 : vector<8xf32> to vector<8x1xf32>
    %16 = tpu.reciprocal %15 {approx = true} : vector<8x1xf32> -> vector<8x1xf32>
    %17 = vector.broadcast %16 : vector<8x1xf32> to vector<8x8xf32>
    %18 = arith.mulf %13, %17 : vector<8x8xf32>
    %19 = arith.truncf %18 : vector<8x8xf32> to vector<8x8xbf16>
    %cst_11 = arith.constant dense<0.000000e+00> : vector<8x8xf32>
    %20 = tpu.matmul %19, %5, %cst_11 {dimension_numbers = #tpu.dot_dimension_numbers<[1], [0], [0], [1], [0, 0, 1, 1], [], []>} : vector<8x8xbf16>, vector<8x8xbf16>, vector<8x8xf32> -> vector<8x8xf32>
    %21 = arith.truncf %20 : vector<8x8xf32> to vector<8x8xbf16>
    %c0_12 = arith.constant 0 : index
    %c0_13 = arith.constant 0 : index
    %c0_14 = arith.constant 0 : index
    %22 = vector.load %arg4[%c0_12, %c0_13, %c0_14] : memref<1x8x8xbf16, #tpu.memory_space<vmem>>, vector<1x8x8xbf16>
    %23 = vector.shape_cast %22 : vector<1x8x8xbf16> to vector<8x8xbf16>
    %24 = vector.shape_cast %21 : vector<8x8xbf16> to vector<1x8x8xbf16>
    tpu.vector_store %arg4[%c0_12, %c0_13, %c0_14], %24 {strides = array<i32>} : memref<1x8x8xbf16, #tpu.memory_space<vmem>>, vector<1x8x8xbf16>,
    return
  }
  func.func @transform_0(%arg0: i32) -> (i32, i32, i32) {
    %c0_i32 = arith.constant 0 : i32
    %c0_i32_0 = arith.constant 0 : i32
    %c0_i32_1 = arith.constant 0 : i32
    return %arg0, %c0_i32, %c0_i32_0 : i32, i32, i32
  }
  func.func @transform_1(%arg0: i32) -> (i32, i32, i32) {
    %c0_i32 = arith.constant 0 : i32
    %c0_i32_0 = arith.constant 0 : i32
    %c0_i32_1 = arith.constant 0 : i32
    return %arg0, %c0_i32, %c0_i32_0 : i32, i32, i32
  }
  func.func @transform_2(%arg0: i32) -> (i32, i32, i32) {
    %c0_i32 = arith.constant 0 : i32
    %c0_i32_0 = arith.constant 0 : i32
    %c0_i32_1 = arith.constant 0 : i32
    return %arg0, %c0_i32, %c0_i32_0 : i32, i32, i32
  }
  func.func @transform_3(%arg0: i32) -> (i32, i32, i32) {
    %c0_i32 = arith.constant 0 : i32
    %c0_i32_0 = arith.constant 0 : i32
    %c0_i32_1 = arith.constant 0 : i32
    return %arg0, %c0_i32, %c0_i32_0 : i32, i32, i32
  }
}

module attributes {stable_mosaic.version = 11 : i64} {
  func.func @attn_out_mlp_kernel(%arg0: i32, %arg1: i32, %arg2: memref<16x32xf32, #tpu.memory_space<vmem>>, %arg3: memref<16x32xbf16, #tpu.memory_space<vmem>>, %arg4: memref<32x32xbf16, #tpu.memory_space<vmem>>, %arg5: memref<1x32xf32, #tpu.memory_space<vmem>>, %arg6: memref<1x32xf32, #tpu.memory_space<vmem>>, %arg7: memref<32x128xbf16, #tpu.memory_space<vmem>>, %arg8: memref<128x32xbf16, #tpu.memory_space<vmem>>, %arg9: memref<16x32xf32, #tpu.memory_space<vmem>>, %arg10: memref<16x32xf32, #tpu.memory_space<vmem>>, %arg11: memref<16x32xbf16, #tpu.memory_space<vmem>>, %arg12: memref<16x32xf32, #tpu.memory_space<vmem>>) attributes {dimension_semantics = [#tpu.dimension_semantics<parallel>, #tpu.dimension_semantics<arbitrary>], iteration_bounds = array<i64: 1, 1>, scalar_prefetch = 0 : i64, scratch_operands = 3 : i64, tpu.core_type = #tpu.core_type<tc>, window_params = [{transform_indices = @transform_0, window_bounds = array<i64: 16, 32>}, {transform_indices = @transform_1, window_bounds = array<i64: 16, 32>}, {pipeline_mode = #tpu.pipeline_mode<synchronous>, transform_indices = @transform_2, window_bounds = array<i64: 32, 32>}, {pipeline_mode = #tpu.pipeline_mode<synchronous>, transform_indices = @transform_3, window_bounds = array<i64: 1, 32>}, {pipeline_mode = #tpu.pipeline_mode<synchronous>, transform_indices = @transform_4, window_bounds = array<i64: 1, 32>}, {transform_indices = @transform_5, window_bounds = array<i64: 32, 128>}, {transform_indices = @transform_6, window_bounds = array<i64: 128, 32>}, {transform_indices = @transform_7, window_bounds = array<i64: 16, 32>}]} {
    %c0_i32 = arith.constant 0 : i32
    %0 = arith.cmpi eq, %arg1, %c0_i32 : i32
    %1 = arith.extui %0 : i1 to i32
    %c0_i32_0 = arith.constant 0 : i32
    %2 = arith.cmpi ne, %1, %c0_i32_0 : i32
    scf.if %2 {
      %c0_17 = arith.constant 0 : index
      %c0_18 = arith.constant 0 : index
      %28 = vector.load %arg3[%c0_17, %c0_18] : memref<16x32xbf16, #tpu.memory_space<vmem>>, vector<16x32xbf16>
      %c0_19 = arith.constant 0 : index
      %c0_20 = arith.constant 0 : index
      %29 = vector.load %arg4[%c0_19, %c0_20] : memref<32x32xbf16, #tpu.memory_space<vmem>>, vector<32x32xbf16>
      %cst_21 = arith.constant dense<0.000000e+00> : vector<16x32xf32>
      %30 = tpu.matmul %28, %29, %cst_21 {dimension_numbers = #tpu.dot_dimension_numbers<[1], [0], [0], [1], [0, 0, 1, 1], [], []>} : vector<16x32xbf16>, vector<32x32xbf16>, vector<16x32xf32> -> vector<16x32xf32>
      %c0_22 = arith.constant 0 : index
      %c0_23 = arith.constant 0 : index
      %31 = vector.load %arg2[%c0_22, %c0_23] : memref<16x32xf32, #tpu.memory_space<vmem>>, vector<16x32xf32>
      %32 = arith.addf %31, %30 : vector<16x32xf32>
      %c0_24 = arith.constant 0 : index
      %c0_25 = arith.constant 0 : index
      %33 = vector.load %arg10[%c0_24, %c0_25] : memref<16x32xf32, #tpu.memory_space<vmem>>, vector<16x32xf32>
      tpu.vector_store %arg10[%c0_24, %c0_25], %32 {strides = array<i32>} : memref<16x32xf32, #tpu.memory_space<vmem>>, vector<16x32xf32>,
      %c0_26 = arith.constant 0 : index
      %c0_27 = arith.constant 0 : index
      %34 = vector.load %arg5[%c0_26, %c0_27] : memref<1x32xf32, #tpu.memory_space<vmem>>, vector<1x32xf32>
      %c0_28 = arith.constant 0 : index
      %c0_29 = arith.constant 0 : index
      %35 = vector.load %arg6[%c0_28, %c0_29] : memref<1x32xf32, #tpu.memory_space<vmem>>, vector<1x32xf32>
      %cst_30 = arith.constant dense<0.000000e+00> : vector<16xf32>
      %36 = vector.multi_reduction <add>, %32, %cst_30 [1] : vector<16x32xf32> to vector<16xf32>
      %37 = vector.shape_cast %36 : vector<16xf32> to vector<16x1xf32>
      %cst_31 = arith.constant 3.200000e+01 : f32
      %38 = vector.broadcast %cst_31 : f32 to vector<16x1xf32>
      %39 = arith.divf %37, %38 : vector<16x1xf32>
      %40 = vector.broadcast %39 : vector<16x1xf32> to vector<16x32xf32>
      %41 = arith.subf %32, %40 : vector<16x32xf32>
      %42 = arith.mulf %41, %41 : vector<16x32xf32>
      %cst_32 = arith.constant dense<0.000000e+00> : vector<16xf32>
      %43 = vector.multi_reduction <add>, %42, %cst_32 [1] : vector<16x32xf32> to vector<16xf32>
      %44 = vector.shape_cast %43 : vector<16xf32> to vector<16x1xf32>
      %cst_33 = arith.constant 3.200000e+01 : f32
      %45 = vector.broadcast %cst_33 : f32 to vector<16x1xf32>
      %46 = arith.divf %44, %45 : vector<16x1xf32>
      %47 = vector.broadcast %39 : vector<16x1xf32> to vector<16x32xf32>
      %48 = arith.subf %32, %47 : vector<16x32xf32>
      %cst_34 = arith.constant 9.99999974E-6 : f32
      %49 = vector.broadcast %cst_34 : f32 to vector<16x1xf32>
      %50 = arith.addf %46, %49 : vector<16x1xf32>
      %51 = math.rsqrt %50 : vector<16x1xf32>
      %52 = vector.broadcast %51 : vector<16x1xf32> to vector<16x32xf32>
      %53 = arith.mulf %48, %52 : vector<16x32xf32>
      %54 = vector.broadcast %34 : vector<1x32xf32> to vector<16x32xf32>
      %55 = arith.mulf %53, %54 : vector<16x32xf32>
      %56 = vector.broadcast %35 : vector<1x32xf32> to vector<16x32xf32>
      %57 = arith.addf %55, %56 : vector<16x32xf32>
      %58 = arith.truncf %57 : vector<16x32xf32> to vector<16x32xbf16>
      %c0_35 = arith.constant 0 : index
      %c0_36 = arith.constant 0 : index
      %59 = vector.load %arg11[%c0_35, %c0_36] : memref<16x32xbf16, #tpu.memory_space<vmem>>, vector<16x32xbf16>
      tpu.vector_store %arg11[%c0_35, %c0_36], %58 {strides = array<i32>} : memref<16x32xbf16, #tpu.memory_space<vmem>>, vector<16x32xbf16>,
      %cst_37 = arith.constant 0.000000e+00 : f32
      %60 = vector.broadcast %cst_37 : f32 to vector<16x32xf32>
      %c0_38 = arith.constant 0 : index
      %c0_39 = arith.constant 0 : index
      %61 = vector.load %arg12[%c0_38, %c0_39] : memref<16x32xf32, #tpu.memory_space<vmem>>, vector<16x32xf32>
      tpu.vector_store %arg12[%c0_38, %c0_39], %60 {strides = array<i32>} : memref<16x32xf32, #tpu.memory_space<vmem>>, vector<16x32xf32>,
    } else {
    }
    %c0 = arith.constant 0 : index
    %c0_1 = arith.constant 0 : index
    %3 = vector.load %arg11[%c0, %c0_1] : memref<16x32xbf16, #tpu.memory_space<vmem>>, vector<16x32xbf16>
    %c0_2 = arith.constant 0 : index
    %c0_3 = arith.constant 0 : index
    %4 = vector.load %arg7[%c0_2, %c0_3] : memref<32x128xbf16, #tpu.memory_space<vmem>>, vector<32x128xbf16>
    %cst = arith.constant dense<0.000000e+00> : vector<16x128xf32>
    %5 = tpu.matmul %3, %4, %cst {dimension_numbers = #tpu.dot_dimension_numbers<[1], [0], [0], [1], [0, 0, 1, 1], [], []>} : vector<16x32xbf16>, vector<32x128xbf16>, vector<16x128xf32> -> vector<16x128xf32>
    %6 = arith.mulf %5, %5 : vector<16x128xf32>
    %7 = arith.mulf %5, %6 : vector<16x128xf32>
    %cst_4 = arith.constant 4.471500e-02 : f32
    %8 = vector.broadcast %cst_4 : f32 to vector<16x128xf32>
    %9 = arith.mulf %8, %7 : vector<16x128xf32>
    %10 = arith.addf %5, %9 : vector<16x128xf32>
    %cst_5 = arith.constant 0.797884583 : f32
    %11 = vector.broadcast %cst_5 : f32 to vector<16x128xf32>
    %12 = arith.mulf %11, %10 : vector<16x128xf32>
    %13 = math.tanh %12 : vector<16x128xf32>
    %cst_6 = arith.constant 1.000000e+00 : f32
    %14 = vector.broadcast %cst_6 : f32 to vector<16x128xf32>
    %15 = arith.addf %14, %13 : vector<16x128xf32>
    %cst_7 = arith.constant 5.000000e-01 : f32
    %16 = vector.broadcast %cst_7 : f32 to vector<16x128xf32>
    %17 = arith.mulf %16, %15 : vector<16x128xf32>
    %18 = arith.mulf %5, %17 : vector<16x128xf32>
    %c0_8 = arith.constant 0 : index
    %c0_9 = arith.constant 0 : index
    %19 = vector.load %arg12[%c0_8, %c0_9] : memref<16x32xf32, #tpu.memory_space<vmem>>, vector<16x32xf32>
    %20 = arith.truncf %18 : vector<16x128xf32> to vector<16x128xbf16>
    %c0_10 = arith.constant 0 : index
    %c0_11 = arith.constant 0 : index
    %21 = vector.load %arg8[%c0_10, %c0_11] : memref<128x32xbf16, #tpu.memory_space<vmem>>, vector<128x32xbf16>
    %cst_12 = arith.constant dense<0.000000e+00> : vector<16x32xf32>
    %22 = tpu.matmul %20, %21, %cst_12 {dimension_numbers = #tpu.dot_dimension_numbers<[1], [0], [0], [1], [0, 0, 1, 1], [], []>} : vector<16x128xbf16>, vector<128x32xbf16>, vector<16x32xf32> -> vector<16x32xf32>
    %23 = arith.addf %19, %22 : vector<16x32xf32>
    %c0_13 = arith.constant 0 : index
    %c0_14 = arith.constant 0 : index
    %24 = vector.load %arg12[%c0_13, %c0_14] : memref<16x32xf32, #tpu.memory_space<vmem>>, vector<16x32xf32>
    tpu.vector_store %arg12[%c0_13, %c0_14], %23 {strides = array<i32>} : memref<16x32xf32, #tpu.memory_space<vmem>>, vector<16x32xf32>,
    %c0_i32_15 = arith.constant 0 : i32
    %25 = arith.cmpi eq, %arg1, %c0_i32_15 : i32
    %26 = arith.extui %25 : i1 to i32
    %c0_i32_16 = arith.constant 0 : i32
    %27 = arith.cmpi ne, %26, %c0_i32_16 : i32
    scf.if %27 {
      %c0_17 = arith.constant 0 : index
      %c0_18 = arith.constant 0 : index
      %28 = vector.load %arg10[%c0_17, %c0_18] : memref<16x32xf32, #tpu.memory_space<vmem>>, vector<16x32xf32>
      %c0_19 = arith.constant 0 : index
      %c0_20 = arith.constant 0 : index
      %29 = vector.load %arg12[%c0_19, %c0_20] : memref<16x32xf32, #tpu.memory_space<vmem>>, vector<16x32xf32>
      %30 = arith.addf %28, %29 : vector<16x32xf32>
      %c0_21 = arith.constant 0 : index
      %c0_22 = arith.constant 0 : index
      %31 = vector.load %arg9[%c0_21, %c0_22] : memref<16x32xf32, #tpu.memory_space<vmem>>, vector<16x32xf32>
      tpu.vector_store %arg9[%c0_21, %c0_22], %30 {strides = array<i32>} : memref<16x32xf32, #tpu.memory_space<vmem>>, vector<16x32xf32>,
    } else {
    }
    return
  }
  func.func @transform_0(%arg0: i32, %arg1: i32) -> (i32, i32) {
    %c0_i32 = arith.constant 0 : i32
    %c0_i32_0 = arith.constant 0 : i32
    return %arg0, %c0_i32 : i32, i32
  }
  func.func @transform_1(%arg0: i32, %arg1: i32) -> (i32, i32) {
    %c0_i32 = arith.constant 0 : i32
    %c0_i32_0 = arith.constant 0 : i32
    return %arg0, %c0_i32 : i32, i32
  }
  func.func @transform_2(%arg0: i32, %arg1: i32) -> (i32, i32) {
    %c0_i32 = arith.constant 0 : i32
    %c0_i32_0 = arith.constant 0 : i32
    %c0_i32_1 = arith.constant 0 : i32
    return %c0_i32, %c0_i32_0 : i32, i32
  }
  func.func @transform_3(%arg0: i32, %arg1: i32) -> (i32, i32) {
    %c0_i32 = arith.constant 0 : i32
    %c0_i32_0 = arith.constant 0 : i32
    %c0_i32_1 = arith.constant 0 : i32
    return %c0_i32, %c0_i32_0 : i32, i32
  }
  func.func @transform_4(%arg0: i32, %arg1: i32) -> (i32, i32) {
    %c0_i32 = arith.constant 0 : i32
    %c0_i32_0 = arith.constant 0 : i32
    %c0_i32_1 = arith.constant 0 : i32
    return %c0_i32, %c0_i32_0 : i32, i32
  }
  func.func @transform_5(%arg0: i32, %arg1: i32) -> (i32, i32) {
    %c0_i32 = arith.constant 0 : i32
    %c0_i32_0 = arith.constant 0 : i32
    return %c0_i32, %arg1 : i32, i32
  }
  func.func @transform_6(%arg0: i32, %arg1: i32) -> (i32, i32) {
    %c0_i32 = arith.constant 0 : i32
    %c0_i32_0 = arith.constant 0 : i32
    return %arg1, %c0_i32 : i32, i32
  }
  func.func @transform_7(%arg0: i32, %arg1: i32) -> (i32, i32) {
    %c0_i32 = arith.constant 0 : i32
    %c0_i32_0 = arith.constant 0 : i32
    return %arg0, %c0_i32 : i32, i32
  }
}

module attributes {stable_mosaic.version = 11 : i64} {
  func.func @head_kernel(%arg0: memref<2x32xf32, #tpu.memory_space<vmem>>, %arg1: memref<1x32xf32, #tpu.memory_space<vmem>>, %arg2: memref<1x32xf32, #tpu.memory_space<vmem>>, %arg3: memref<32x128xbf16, #tpu.memory_space<vmem>>, %arg4: memref<2x128xf32, #tpu.memory_space<vmem>>) attributes {dimension_semantics = [], scalar_prefetch = 0 : i64, scratch_operands = 0 : i64, tpu.core_type = #tpu.core_type<tc>} {
    %c0 = arith.constant 0 : index
    %c0_0 = arith.constant 0 : index
    %0 = vector.load %arg0[%c0, %c0_0] : memref<2x32xf32, #tpu.memory_space<vmem>>, vector<2x32xf32>
    %c0_1 = arith.constant 0 : index
    %c0_2 = arith.constant 0 : index
    %1 = vector.load %arg1[%c0_1, %c0_2] : memref<1x32xf32, #tpu.memory_space<vmem>>, vector<1x32xf32>
    %c0_3 = arith.constant 0 : index
    %c0_4 = arith.constant 0 : index
    %2 = vector.load %arg2[%c0_3, %c0_4] : memref<1x32xf32, #tpu.memory_space<vmem>>, vector<1x32xf32>
    %cst = arith.constant dense<0.000000e+00> : vector<2xf32>
    %3 = vector.multi_reduction <add>, %0, %cst [1] : vector<2x32xf32> to vector<2xf32>
    %4 = vector.shape_cast %3 : vector<2xf32> to vector<2x1xf32>
    %cst_5 = arith.constant 3.200000e+01 : f32
    %5 = vector.broadcast %cst_5 : f32 to vector<2x1xf32>
    %6 = arith.divf %4, %5 : vector<2x1xf32>
    %7 = vector.broadcast %6 : vector<2x1xf32> to vector<2x32xf32>
    %8 = arith.subf %0, %7 : vector<2x32xf32>
    %9 = arith.mulf %8, %8 : vector<2x32xf32>
    %cst_6 = arith.constant dense<0.000000e+00> : vector<2xf32>
    %10 = vector.multi_reduction <add>, %9, %cst_6 [1] : vector<2x32xf32> to vector<2xf32>
    %11 = vector.shape_cast %10 : vector<2xf32> to vector<2x1xf32>
    %cst_7 = arith.constant 3.200000e+01 : f32
    %12 = vector.broadcast %cst_7 : f32 to vector<2x1xf32>
    %13 = arith.divf %11, %12 : vector<2x1xf32>
    %14 = vector.broadcast %6 : vector<2x1xf32> to vector<2x32xf32>
    %15 = arith.subf %0, %14 : vector<2x32xf32>
    %cst_8 = arith.constant 9.99999974E-6 : f32
    %16 = vector.broadcast %cst_8 : f32 to vector<2x1xf32>
    %17 = arith.addf %13, %16 : vector<2x1xf32>
    %18 = math.rsqrt %17 : vector<2x1xf32>
    %19 = vector.broadcast %18 : vector<2x1xf32> to vector<2x32xf32>
    %20 = arith.mulf %15, %19 : vector<2x32xf32>
    %21 = vector.broadcast %1 : vector<1x32xf32> to vector<2x32xf32>
    %22 = arith.mulf %20, %21 : vector<2x32xf32>
    %23 = vector.broadcast %2 : vector<1x32xf32> to vector<2x32xf32>
    %24 = arith.addf %22, %23 : vector<2x32xf32>
    %25 = arith.truncf %24 : vector<2x32xf32> to vector<2x32xbf16>
    %c0_9 = arith.constant 0 : index
    %c0_10 = arith.constant 0 : index
    %26 = vector.load %arg3[%c0_9, %c0_10] : memref<32x128xbf16, #tpu.memory_space<vmem>>, vector<32x128xbf16>
    %cst_11 = arith.constant dense<0.000000e+00> : vector<2x128xf32>
    %27 = tpu.matmul %25, %26, %cst_11 {dimension_numbers = #tpu.dot_dimension_numbers<[1], [0], [0], [1], [0, 0, 1, 1], [], []>} : vector<2x32xbf16>, vector<32x128xbf16>, vector<2x128xf32> -> vector<2x128xf32>
    %c0_12 = arith.constant 0 : index
    %c0_13 = arith.constant 0 : index
    %28 = vector.load %arg4[%c0_12, %c0_13] : memref<2x128xf32, #tpu.memory_space<vmem>>, vector<2x128xf32>
    tpu.vector_store %arg4[%c0_12, %c0_13], %27 {strides = array<i32>} : memref<2x128xf32, #tpu.memory_space<vmem>>, vector<2x128xf32>,
    return
  }
}

</mosaic_0001>

<bundles_post_ra>
// kernel: bert_forward.8
= control target key start
LH: loop header
LB: loop body
LE: loop exit
PB: predicated region body
PF: predicated region fallthrough
CT: control target
= control target key end

     0   :  { %s464_s12 = smov 0   ;;  %s498_s0 = inlined_call_operand.vmem [shape: bf16[8,8,8], index: 0, kind: input, shape index: {}]   ;;  %s499_s1 = inlined_call_operand.vmem [shape: bf16[8,8,8], index: 1, kind: input, shape index: {}]   ;;  %s500_s2 = inlined_call_operand.vmem [shape: bf16[8,8,8], index: 2, kind: input, shape index: {}]   ;;  %s501_s3 = inlined_call_operand.vmem [shape: bf16[8,8,8], index: 3, kind: output, shape index: {}]  }
   0x1 LB: > { %s391_s13 = sadd.s32 4294967295, %s440_s12   ;;  %p395_p0 = scmp.ge.s32.totalorder %s440_s12, 1  ;;  %s440_s12 = sphi %s464_s12, %s13_s12  }
   0x2   : > { %p154_p1 = scmp.lt.s32.totalorder %s440_s12, 9 }
   0x4   : > { %p155_p2 = pnand %p395_p0, %p154_p1 }
   0x5   : > { %p184_p3 = scmp.lt.s32.totalorder (!%p155_p2), %s391_s13, 7  ;;  %v442_v0 = vmov (!%p155_p2), 0.0   ;;  %vm443_vm0 = vmmov (!%p155_p2), 0   ;;  %vm204_vm1 = vcmask (!%p155_p2), 64512   ;;  %vm267_vm2 = vcmask (!%p155_p2), 1043456  }
   0x6   : > { %158 = sbr.rel (%p155_p2) target bundleno = 770 (0x302), region = 32  ;;  %408 = vmatprep.subr.bf16.mxu0 (!%p155_p2), %v442_v0  ;;  %410 = vmatprep.mubr.msk.bf16.mxu0 (!%p155_p2), %vm443_vm0, %v442_v0  ;;  %vm312_vm3 = vcmask (!%p155_p2), 60416  }
   0x7   : > { %414 = vmatprep.subr.bf16.mxu1 (!%p155_p2), %v442_v0  ;;  %416 = vmatprep.mubr.msk.bf16.mxu1 (!%p155_p2), %vm443_vm0, %v442_v0 }
   0xd   : > { %s503_s13 = smov (!%p184_p3, %s391_s13), 7 }
   0xe   : > { %s472_s14 = sshll.u32 %s503_s13, 2 }
   0xf   : > { %s191_s17 = scalar_lea.vmem %s499_s1, %s472_s14  ;;  %s187_s20 = scalar_lea.vmem %s498_s0, %s472_s14 }
  0x10   : > { %v202_v1 = vld [vmem:[%s191_s17] sm:$0xf]  ;;  %s195_s23 = scalar_lea.vmem %s500_s2, %s472_s14  ;;  %s199_s26 = scalar_lea.vmem %s501_s3, %s472_s14 }
  0x11   : > { %v209_v2 = vsel %vm204_vm1, %v202_v1, 0  ;;  %v201_v3 = vld [vmem:[%s187_s20] sm:$0xf] }
  0x12   : > { %409 = vmatpush3.bf16.xpose.msra.mxu0 %v209_v2  ;;  %v203_v15 = vld [vmem:[%s195_s23] sm:$0xf] }
  0x13   : > { %v269_v16 = vsel %vm267_vm2, %v203_v15, 0 }
  0x14   : > { %415 = vmatpush3.bf16.msra.mxu1 %v269_v16 }
  0x19   : > { %411 = vmatmul.mubr.msk.bf16.vlgmr.msra.gmra.mrb[0].mxu0 %vm204_vm1, %v201_v3 }
  0xec   : > { %v245_v4 = vpop.f32.mrb[0].mxu0 }
  0xed   : > { %v251_v5 = vmul.f32 0.35355338, %v245_v4  ;;  %v412_v6 = vpop.f32.mrb[1].mxu0 }
  0xee   : > { %v248_v7 = vpop.f32.mrb[2].mxu0 }
  0xef   : > { %v413_v8 = vpop.f32.mrb[3].mxu0  ;;  %v252_v9 = vsel %vm204_vm1, %v251_v5, -inf }
  0xf0   : > { %253 = vmax.xlane.f32.xlu0 %v252_v9 }
 0x17d   : > { %v254_v10 = vpop.xlane.xlu0 %253 }
 0x17e   : > { %v255_v11 = vsub.f32 %v251_v5, %v254_v10 }
 0x180   : > { %v256_v12 = vmul.f32 1.442695, %v255_v11 }
 0x182   : > { %430 = vpow2.f32 %v256_v12 }
 0x18c   : > { %v431_v13 = vpop.eup %430 }
 0x18d   : > { %v258_v14 = vsel %vm204_vm1, %v431_v13, 0.0 }
 0x18e   : > { %259 = vadd.xlane.f32.xlu0 %v258_v14 }
 0x21b   : > { %v260_v17 = vpop.xlane.xlu0 %259 }
 0x21c   : > { %432 = vrcp.f32 %v260_v17 }
 0x226   : > { %v433_v18 = vpop.eup %432 }
 0x227   : > { %v262_v19 = vmul.f32 %v433_v18, %v431_v13 }
 0x229   : > { %v263_v20 = vpack.c.bf16 %v262_v19, %v262_v19 }
 0x22b   : > { %417 = vmatmul.mubr.msk.bf16.vlgmr.msra.gmra.mrb[0].mxu1 %vm204_vm1, %v263_v20 }
 0x2fe   : > { %v305_v21 = vpop.f32.mrb[0].mxu1 }
 0x2ff   : > { %v311_v22 = vpack.c.bf16 %v305_v21, %v305_v21  ;;  %v418_v23 = vpop.f32.mrb[1].mxu1 }
 0x300   : > { %v308_v24 = vpop.f32.mrb[2].mxu1 }
 0x301   : > { %313 = vst.msk [vmem:[%s199_s26] sm:$0xf] %vm312_vm3, %v311_v22  ;;  %v419_v25 = vpop.f32.mrb[3].mxu1 }
 0x302 PF: > { %s13_s12 = sadd.s32 1, %s440_s12  }
 0x303   : > { %p10_p4 = scmp.ge.s32.totalorder %s13_s12, 10  }
 0x305   :  { %12 = sbr.rel (!%p10_p4) target bundleno = 1 (0x1), region = 68 }

// kernel: bert_forward.7
= control target key start
LH: loop header
LB: loop body
LE: loop exit
PB: predicated region body
PF: predicated region fallthrough
CT: control target
= control target key end

     0   :  { %vm22_vm0 = vcmask 261120   ;;  %v170_v15 = vmov 0.0   ;;  %vm171_vm1 = vmmov 0   ;;  %vm135_vm2 = vcmask 781312   ;;  %s226_s0 = inlined_call_operand.vmem [shape: f32[16,32], index: 0, kind: input, shape index: {}]   ;;  %s227_s3 = inlined_call_operand.vmem [shape: bf16[32,96], index: 3, kind: input, shape index: {}]   ;;  %s228_s1 = inlined_call_operand.vmem [shape: f32[1,32], index: 1, kind: input, shape index: {}]   ;;  %s229_s2 = inlined_call_operand.vmem [shape: f32[1,32], index: 2, kind: input, shape index: {}]   ;;  %s230_s4 = inlined_call_operand.vmem [shape: bf16[16,96], index: 4, kind: output, shape index: {}]  }
   0x1   :  { %v18_v0 = vld [vmem:[%s226_s0] sm:$0xff]  ;;  %v19_v1 = vld [vmem:[%s226_s0 + $0x8] sm:$0xff]  ;;  %154 = vmatprep.subr.bf16.mxu0 %v170_v15  ;;  %158 = vmatprep.mubr.msk.bf16.mxu0 %vm171_vm1, %v170_v15 }
   0x2   :  { %v23_v2 = vsel %vm22_vm0, %v18_v0, 0.0  ;;  %v26_v3 = vsel %vm22_vm0, %v19_v1, 0.0  ;;  %v164_v14 = vld [vmem:[%s227_s3] sm:$0xff]   ;;  %v165_v16 = vld [vmem:[%s227_s3 + $0x8] sm:$0xff]  }
   0x3   :  { %24 = vadd.xlane.f32.xlu0 %v23_v2  ;;  %155 = vmatpush3.bf16.msra.mxu0 %v164_v14  ;;  %v142_v25 = vld [vmem:[%s228_s1] ss:$0 sm:$0xff] }
   0x4   :  { %156 = vmatprep.subr.bf16.mxu0 %v170_v15  ;;  %v143_v29 = vld [vmem:[%s229_s2] ss:$0 sm:$0xff] }
   0x7   :  { %27 = vadd.xlane.f32.xlu0 %v26_v3  ;;  %157 = vmatpush3.bf16.msra.mxu0 %v165_v16 }
  0x90   :  { %v25_v4 = vpop.xlane.xlu0 %24 }
  0x91   :  { %v30_v5 = vmul.f32 0.03125, %v25_v4 }
  0x93   :  { %v32_v6 = vsub.f32 %v18_v0, %v30_v5 }
  0x94   :  { %v28_v7 = vpop.xlane.xlu0 %27 }
  0x95   :  { %v31_v8 = vmul.f32 0.03125, %v28_v7  ;;  %v34_v9 = vmul.f32 %v32_v6, %v32_v6 }
  0x97   :  { %v33_v10 = vsub.f32 %v19_v1, %v31_v8  ;;  %v36_v11 = vsel %vm22_vm0, %v34_v9, 0.0 }
  0x98   :  { %37 = vadd.xlane.f32.xlu1 %v36_v11 }
  0x99   :  { %v35_v12 = vmul.f32 %v33_v10, %v33_v10 }
  0x9b   :  { %v39_v13 = vsel %vm22_vm0, %v35_v12, 0.0 }
  0x9c   :  { %40 = vadd.xlane.f32.xlu1 %v39_v13 }
 0x125   :  { %v38_v17 = vpop.xlane.xlu1 %37 }
 0x126   :  { %v42_v18 = vmul.f32 0.03125, %v38_v17 }
 0x128   :  { %v44_v19 = vadd.f32 1e-05, %v42_v18 }
 0x129   :  { %v41_v20 = vpop.xlane.xlu1 %40 }
 0x12a   :  { %166 = vrsqrt.f32 %v44_v19  ;;  %v43_v21 = vmul.f32 0.03125, %v41_v20 }
 0x12c   :  { %v45_v22 = vadd.f32 1e-05, %v43_v21 }
 0x12e   :  { %168 = vrsqrt.f32 %v45_v22 }
 0x134   :  { %v167_v23 = vpop.eup %166 }
 0x135   :  { %v48_v24 = vmul.f32 %v167_v23, %v32_v6 }
 0x137   :  { %v56_v28 = vmul.f32 %v142_v25, %v48_v24 }
 0x138   :  { %v169_v26 = vpop.eup %168 }
 0x139   :  { %v49_v27 = vmul.f32 %v169_v26, %v33_v10  ;;  %v64_v31 = vadd.f32 %v143_v29, %v56_v28 }
 0x13b   :  { %v57_v30 = vmul.f32 %v142_v25, %v49_v27 }
 0x13d   :  { %v65_v32 = vadd.f32 %v143_v29, %v57_v30 }
 0x13f   :  { %v66_v33 = vpack.c.bf16 %v65_v32, %v64_v31 }
 0x141   :  { %159 = vmatmul.mubr.msk.bf16.vlgmr.msra.gmra.mrb[0].mxu0 %vm22_vm0, %v66_v33 }
 0x214   :  { %v120_v34 = vpop.f32.mrb[0].mxu0 }
 0x215   :  { %v149_v35 = vpack.c.bf16 %v120_v34, %v120_v34  ;;  %v160_v36 = vpop.f32.mrb[1].mxu0 }
 0x216   :  { %v123_v37 = vpop.f32.mrb[2].mxu0 }
 0x217   :  { %136 = vst.msk [vmem:[%s230_s4] sm:$0xf] %vm135_vm2, %v149_v35  ;;  %v150_v38 = vpack.c.bf16 %v123_v37, %v123_v37  ;;  %v161_v39 = vpop.f32.mrb[3].mxu0 }
 0x219   :  { %137 = vst.msk [vmem:[%s230_s4 + $0x4] sm:$0xf] %vm135_vm2, %v150_v38 }

// kernel: bert_forward.13
= control target key start
LH: loop header
LB: loop body
LE: loop exit
PB: predicated region body
PF: predicated region fallthrough
CT: control target
= control target key end

     0   :  { %vm22_vm0 = vcmask 254976   ;;  %s229_s0 = inlined_call_operand.vmem [shape: f32[2,32], index: 0, kind: input, shape index: {}]   ;;  %s230_s1 = inlined_call_operand.vmem [shape: f32[1,32], index: 1, kind: input, shape index: {}]   ;;  %s231_s2 = inlined_call_operand.vmem [shape: f32[1,32], index: 2, kind: input, shape index: {}]   ;;  %s232_s3 = inlined_call_operand.vmem [shape: bf16[32,128], index: 3, kind: input, shape index: {}]   ;;  %s233_s4 = inlined_call_operand.hbm [shape: f32[2,128], index: 4, kind: output, shape index: {}]  }
   0x1   :  { %v19_v0 = vld [vmem:[%s229_s0] sm:$0x3] }
   0x2   :  { %v23_v1 = vsel %vm22_vm0, %v19_v0, 0.0 }
   0x3   :  { %24 = vadd.xlane.f32.xlu0 %v23_v1 }
   0x4   :  { %9 = vsyncpa [#allocation3], 0  ;;  %v146_v7 = vld [vmem:[%s232_s3] sm:$0xff]   ;;  %v174_v8 = vmov 0.0   ;;  %v147_v9 = vld [vmem:[%s232_s3 + $0x8] sm:$0xff]   ;;  %vm175_vm1 = vmmov 0  }
   0x5   :  { %135 = vmatprep.subr.bf16.mxu0 %v174_v8  ;;  %139 = vmatprep.mubr.msk.bf16.mxu0 %vm175_vm1, %v174_v8  ;;  %v127_v14 = vld [vmem:[%s230_s1] ss:$0 sm:$0xff]  ;;  %vm68_vm2 = vcmask 261120   ;;  %s176_s3 = smov [#allocation2]  }
   0x6   :  { %136 = vmatpush3.bf16.msra.mxu0 %v146_v7  ;;  %v128_v16 = vld [vmem:[%s231_s2] ss:$0 sm:$0xff]  ;;  %s119_s24 = sshll.u32 %s176_s3, 4  ;;  %s120_s24 = int_to_ptr.vmem [resolvable:$true] %s119_s24 }
   0x7   :  { %137 = vmatprep.subr.bf16.mxu0 %v174_v8  ;;  %s150_s25 = scalar_lea.vmem %s120_s24, 32  ;;  %p155_p1 = scmp.lt.s32.totalorder %s120_s24, %s120_s24 }
   0x8   :  { %p151_p0 = scmp.ne.s32.totalorder %s120_s24, %s150_s25  ;;  %p156_p2 = scmp.lt.s32.totalorder %s150_s25, %s150_s25 }
   0xa   :  { %138 = vmatpush3.bf16.msra.mxu0 %v147_v9  ;;  %p157_p3 = por %p156_p2, %p155_p1 }
   0xc   :  { %p158_p4 = pnand %p157_p3, %p151_p0 }
  0x90   :  { %v25_v2 = vpop.xlane.xlu0 %24 }
  0x91   :  { %v27_v3 = vmul.f32 0.03125, %v25_v2 }
  0x93   :  { %v28_v4 = vsub.f32 %v19_v0, %v27_v3 }
  0x95   :  { %v29_v5 = vmul.f32 %v28_v4, %v28_v4 }
  0x97   :  { %v30_v6 = vsel %vm22_vm0, %v29_v5, 0.0 }
  0x98   :  { %31 = vadd.xlane.f32.xlu0 %v30_v6 }
 0x125   :  { %v32_v10 = vpop.xlane.xlu0 %31 }
 0x126   :  { %v33_v11 = vmul.f32 0.03125, %v32_v10 }
 0x128   :  { %v34_v12 = vadd.f32 1e-05, %v33_v11 }
 0x12a   :  { %148 = vrsqrt.f32 %v34_v12 }
 0x134   :  { %v149_v13 = vpop.eup %148 }
 0x135   :  { %v36_v15 = vmul.f32 %v149_v13, %v28_v4 }
 0x137   :  { %v43_v17 = vmul.f32 %v127_v14, %v36_v15 }
 0x139   :  { %v50_v18 = vadd.f32 %v128_v16, %v43_v17 }
 0x13b   :  { %v51_v19 = vpack.c.bf16 %v50_v18, %v50_v18 }
 0x13d   :  { %140 = vmatmul.mubr.msk.bf16.vlgmr.msra.gmra.mrb[0].mxu0 %vm68_vm2, %v51_v19 }
 0x210   :  { %v106_v20 = vpop.f32.mrb[0].mxu0 }
 0x211   :  { %112 = vst [vmem:[#allocation2] sm:$0x3] %v106_v20  ;;  %v141_v21 = vpop.f32.mrb[1].mxu0 }
 0x212   :  { %v109_v22 = vpop.f32.mrb[2].mxu0 }
 0x213   :  { %161 = shalt.err (!%p158_p4)
}
 0x214   :  { %s162_s26 = scalar_lea.hbm %s233_s4, 32 }
 0x215   :  { %p163_p5 = scmp.ne.s32.totalorder %s233_s4, %s162_s26  ;;  %p166_p6 = scmp.lt.u32.totalorder %s162_s26, %s233_s4 }
 0x217   :  { %p168_p7 = pnand %p166_p6, %p163_p5 }
 0x219   :  { %171 = shalt.err (!%p168_p7)
}
 0x21a   :  { %122 = dma.vmem_to_hbm [thread:$0]  %s120_s24, 32, %s233_s4, [#allocation3]   ;;  %v142_v23 = vpop.f32.mrb[3].mxu0 }
 0x21b   :  { %172 = dma.done.wait [#allocation3], 32  }
 0x21c   :  { %173 = vsyncadd [#allocation3], 4294967264 }
 0x21d   :  { %126 = vsyncpa [#allocation3], 1 }

// kernel: bert_forward.9
= control target key start
LH: loop header
LB: loop body
LE: loop exit
PB: predicated region body
PF: predicated region fallthrough
CT: control target
= control target key end

     0   :  { %vm54_vm0 = vcmask 261120   ;;  %v452_v0 = vmov 0.0   ;;  %vm453_vm1 = vmmov 0   ;;  %s583_s2 = inlined_call_operand.vmem [shape: bf16[32,32], index: 2, kind: input, shape index: {}]   ;;  %s584_s1 = inlined_call_operand.vmem [shape: bf16[16,32], index: 1, kind: input, shape index: {}]   ;;  %s585_s0 = inlined_call_operand.vmem [shape: f32[16,32], index: 0, kind: input, shape index: {}]   ;;  %s586_s5 = inlined_call_operand.vmem [shape: bf16[32,128], index: 5, kind: input, shape index: {}]   ;;  %s587_s3 = inlined_call_operand.vmem [shape: f32[1,32], index: 3, kind: input, shape index: {}]   ;;  %s588_s4 = inlined_call_operand.vmem [shape: f32[1,32], index: 4, kind: input, shape index: {}]   ;;  %s589_s6 = inlined_call_operand.vmem [shape: bf16[128,32], index: 6, kind: input, shape index: {}]   ;;  %s590_s7 = inlined_call_operand.vmem [shape: f32[16,32], index: 7, kind: output, shape index: {}]  }
   0x1   :  { %393 = vmatprep.subr.bf16.mxu1 %v452_v0  ;;  %v431_v1 = vld [vmem:[%s583_s2] sm:$0xff]   ;;  %397 = vmatprep.mubr.msk.bf16.mxu1 %vm453_vm1, %v452_v0  ;;  %152 = vst.msk [vmem:[#allocation4] sm:$0xff] %vm54_vm0, %v452_v0  ;;  %153 = vst.msk [vmem:[#allocation4 + $0x8] sm:$0xff] %vm54_vm0, %v452_v0  ;;  %v432_v2 = vld [vmem:[%s583_s2 + $0x8] sm:$0xff]  }
   0x2   :  { %409 = vmatprep.subr.bf16.mxu0 %v452_v0  ;;  %425 = vmatprep.mubr.msk.bf16.mxu0 %vm453_vm1, %v452_v0  ;;  %v433_v3 = vld [vmem:[%s584_s1] sm:$0xff]   ;;  %v100_v6 = vld [vmem:[%s585_s0 + $0x8] sm:$0xff]  ;;  %v438_v46 = vld [vmem:[%s589_s6 + $0x10] sm:$0xff]  }
   0x3   :  { %394 = vmatpush3.bf16.msra.mxu1 %v431_v1  ;;  %v99_v4 = vld [vmem:[%s585_s0] sm:$0xff]  ;;  %v435_v25 = vld [vmem:[%s586_s5 + $0x8] sm:$0xff]   ;;  %v439_v47 = vld [vmem:[%s589_s6 + $0x18] sm:$0xff]  }
   0x4   :  { %395 = vmatprep.subr.bf16.mxu1 %v452_v0  ;;  %v434_v24 = vld [vmem:[%s586_s5] sm:$0xff]   ;;  %v437_v45 = vld [vmem:[%s589_s6 + $0x8] sm:$0xff]   ;;  %v442_v50 = vld [vmem:[%s589_s6 + $0x30] sm:$0xff]  }
   0x5   :  { %v365_v34 = vld [vmem:[%s587_s3] ss:$0 sm:$0xff]  ;;  %v441_v49 = vld [vmem:[%s589_s6 + $0x28] sm:$0xff]   ;;  %v443_v51 = vld [vmem:[%s589_s6 + $0x38] sm:$0xff]  }
   0x6   :  { %v366_v38 = vld [vmem:[%s588_s4] ss:$0 sm:$0xff] }
   0x7   :  { %396 = vmatpush3.bf16.msra.mxu1 %v432_v2  ;;  %v436_v44 = vld [vmem:[%s589_s6] sm:$0xff]  }
   0x8   :  { %401 = vmatprep.subr.bf16.mxu1 %v452_v0  ;;  %410 = vmatpush3.bf16.msra.mxu0 %v436_v44  ;;  %v440_v48 = vld [vmem:[%s589_s6 + $0x20] sm:$0xff]  }
   0x9   :  { %411 = vmatprep.subr.bf16.mxu0 %v452_v0 }
   0xa   :  { %398 = vmatmul.mubr.msk.bf16.vlgmr.msra.gmra.mrb[0].mxu1 %vm54_vm0, %v433_v3 }
   0xb   :  { %405 = vmatprep.mubr.msk.bf16.mxu1 %vm453_vm1, %v452_v0  ;;  %402 = vmatpush3.bf16.msra.mxu1 %v434_v24 }
   0xc   :  { %403 = vmatprep.subr.bf16.mxu1 %v452_v0  ;;  %412 = vmatpush3.bf16.msra.mxu0 %v437_v45 }
   0xd   :  { %413 = vmatprep.subr.bf16.mxu0 %v452_v0 }
   0xf   :  { %404 = vmatpush3.bf16.msra.mxu1 %v435_v25 }
  0x10   :  { %414 = vmatpush3.bf16.msra.mxu0 %v438_v46 }
  0x11   :  { %415 = vmatprep.subr.bf16.mxu0 %v452_v0 }
  0x14   :  { %416 = vmatpush3.bf16.msra.mxu0 %v439_v47 }
  0x15   :  { %417 = vmatprep.subr.bf16.mxu0 %v452_v0 }
  0x18   :  { %418 = vmatpush3.bf16.msra.mxu0 %v440_v48 }
  0x19   :  { %419 = vmatprep.subr.bf16.mxu0 %v452_v0 }
  0x1c   :  { %420 = vmatpush3.bf16.msra.mxu0 %v441_v49 }
  0x1d   :  { %421 = vmatprep.subr.bf16.mxu0 %v452_v0 }
  0x20   :  { %422 = vmatpush3.bf16.msra.mxu0 %v442_v50 }
  0x21   :  { %423 = vmatprep.subr.bf16.mxu0 %v452_v0 }
  0x24   :  { %424 = vmatpush3.bf16.msra.mxu0 %v443_v51 }
  0xdd   :  { %v92_v5 = vpop.f32.mrb[0].mxu1 }
  0xde   :  { %v101_v7 = vadd.f32 %v99_v4, %v92_v5  ;;  %v399_v8 = vpop.f32.mrb[1].mxu1 }
  0xdf   :  { %v95_v9 = vpop.f32.mrb[2].mxu1 }
  0xe0   :  { %103 = vst.msk [vmem:[#allocation2] sm:$0xff] %vm54_vm0, %v101_v7  ;;  %v102_v10 = vadd.f32 %v100_v6, %v95_v9  ;;  %v400_v11 = vpop.f32.mrb[3].mxu1  ;;  %v107_v12 = vsel %vm54_vm0, %v101_v7, 0.0 }
  0xe1   :  { %108 = vadd.xlane.f32.xlu0 %v107_v12  ;;  %v234_v11 = vld [vmem:[#allocation4] sm:$0xff] }
  0xe2   :  { %104 = vst.msk [vmem:[#allocation2 + $0x8] sm:$0xff] %vm54_vm0, %v102_v10  ;;  %v110_v13 = vsel %vm54_vm0, %v102_v10, 0.0 }
  0xe5   :  { %111 = vadd.xlane.f32.xlu0 %v110_v13  ;;  %v235_v13 = vld [vmem:[#allocation4 + $0x8] sm:$0xff] }
 0x16e   :  { %v109_v14 = vpop.xlane.xlu0 %108 }
 0x16f   :  { %v114_v15 = vmul.f32 0.03125, %v109_v14 }
 0x171   :  { %v116_v16 = vsub.f32 %v101_v7, %v114_v15 }
 0x172   :  { %v112_v17 = vpop.xlane.xlu0 %111 }
 0x173   :  { %v115_v18 = vmul.f32 0.03125, %v112_v17  ;;  %v118_v19 = vmul.f32 %v116_v16, %v116_v16 }
 0x175   :  { %v117_v20 = vsub.f32 %v102_v10, %v115_v18  ;;  %v120_v21 = vsel %vm54_vm0, %v118_v19, 0.0  ;;  %v349_v19 = vld [vmem:[#allocation2] sm:$0xff] }
 0x176   :  { %121 = vadd.xlane.f32.xlu1 %v120_v21 }
 0x177   :  { %v119_v22 = vmul.f32 %v117_v20, %v117_v20 }
 0x179   :  { %v123_v23 = vsel %vm54_vm0, %v119_v22, 0.0  ;;  %v350_v22 = vld [vmem:[#allocation2 + $0x8] sm:$0xff] }
 0x17a   :  { %124 = vadd.xlane.f32.xlu1 %v123_v23 }
 0x203   :  { %v122_v26 = vpop.xlane.xlu1 %121 }
 0x204   :  { %v126_v27 = vmul.f32 0.03125, %v122_v26 }
 0x206   :  { %v128_v28 = vadd.f32 1e-05, %v126_v27 }
 0x207   :  { %v125_v29 = vpop.xlane.xlu1 %124 }
 0x208   :  { %444 = vrsqrt.f32 %v128_v28  ;;  %v127_v30 = vmul.f32 0.03125, %v125_v29 }
 0x20a   :  { %v129_v31 = vadd.f32 1e-05, %v127_v30 }
 0x20c   :  { %446 = vrsqrt.f32 %v129_v31 }
 0x212   :  { %v445_v32 = vpop.eup %444 }
 0x213   :  { %v132_v33 = vmul.f32 %v445_v32, %v116_v16 }
 0x215   :  { %v140_v36 = vmul.f32 %v365_v34, %v132_v33 }
 0x216   :  { %v447_v35 = vpop.eup %446 }
 0x217   :  { %v133_v37 = vmul.f32 %v447_v35, %v117_v20  ;;  %v148_v40 = vadd.f32 %v366_v38, %v140_v36 }
 0x219   :  { %v141_v39 = vmul.f32 %v365_v34, %v133_v37 }
 0x21b   :  { %v149_v41 = vadd.f32 %v366_v38, %v141_v39 }
 0x21d   :  { %v150_v42 = vpack.c.bf16 %v149_v41, %v148_v40 }
 0x21f   :  { %151 = vst.msk [vmem:[#allocation3] sm:$0xff] %vm54_vm0, %v150_v42 }
 0x226   :  { %v154_v43 = vld [vmem:[#allocation3] sm:$0xff] }
 0x227   :  { %406 = vmatmul.mubr.msk.bf16.vlgmr.msra.gmra.mrb[4].mxu1 %vm54_vm0, %v154_v43 }
 0x2fa   :  { %v209_v52 = vpop.f32.mrb[4].mxu1 }
 0x2fb   :  { %v216_v53 = vmul.f32 %v209_v52, %v209_v52  ;;  %v407_v54 = vpop.f32.mrb[5].mxu1 }
 0x2fc   :  { %v212_v55 = vpop.f32.mrb[6].mxu1 }
 0x2fd   :  { %v218_v56 = vmul.f32 %v216_v53, %v209_v52  ;;  %v217_v57 = vmul.f32 %v212_v55, %v212_v55  ;;  %v408_v58 = vpop.f32.mrb[7].mxu1 }
 0x2ff   :  { %v220_v59 = vmul.f32 0.044715, %v218_v56  ;;  %v219_v60 = vmul.f32 %v217_v57, %v212_v55 }
 0x301   :  { %v222_v61 = vadd.f32 %v220_v59, %v209_v52  ;;  %v221_v62 = vmul.f32 0.044715, %v219_v60 }
 0x303   :  { %v224_v63 = vmul.f32 0.7978846, %v222_v61  ;;  %v223_v1 = vadd.f32 %v221_v62, %v212_v55 }
 0x305   :  { %448 = vtanh.f32 %v224_v63  ;;  %v225_v0 = vmul.f32 0.7978846, %v223_v1 }
 0x307   :  { %450 = vtanh.f32 %v225_v0 }
 0x30f   :  { %v449_v2 = vpop.eup %448 }
 0x310   :  { %v228_v3 = vadd.f32 1.0, %v449_v2 }
 0x311   :  { %v451_v4 = vpop.eup %450 }
 0x312   :  { %v230_v5 = vmul.f32 0.5, %v228_v3  ;;  %v229_v6 = vadd.f32 1.0, %v451_v4 }
 0x314   :  { %v231_v7 = vmul.f32 0.5, %v229_v6  ;;  %v232_v8 = vmul.f32 %v230_v5, %v209_v52 }
 0x316   :  { %v233_v9 = vmul.f32 %v231_v7, %v212_v55 }
 0x318   :  { %v236_v10 = vpack.c.bf16 %v233_v9, %v232_v8 }
 0x31a   :  { %426 = vmatmul.mubr.bf16.vlgmr.msra.gmra.mrb[0].mxu0 %v236_v10 }
 0x3ed   :  { %v335_v12 = vpop.f32.mrb[0].mxu0 }
 0x3ee   :  { %v342_v14 = vadd.f32 %v335_v12, %v234_v11  ;;  %v427_v15 = vpop.f32.mrb[1].mxu0 }
 0x3ef   :  { %v338_v16 = vpop.f32.mrb[2].mxu0 }
 0x3f0   :  { %344 = vst.msk [vmem:[#allocation4] sm:$0xff] %vm54_vm0, %v342_v14  ;;  %v343_v17 = vadd.f32 %v338_v16, %v235_v13  ;;  %v428_v18 = vpop.f32.mrb[3].mxu0 }
 0x3f2   :  { %345 = vst.msk [vmem:[#allocation4 + $0x8] sm:$0xff] %vm54_vm0, %v343_v17 }
 0x3f7   :  { %v351_v20 = vld [vmem:[#allocation4] sm:$0xff] }
 0x3f8   :  { %v353_v21 = vadd.f32 %v351_v20, %v349_v19 }
 0x3f9   :  { %v352_v23 = vld [vmem:[#allocation4 + $0x8] sm:$0xff] }
 0x3fa   :  { %355 = vst.msk [vmem:[%s590_s7] sm:$0xff] %vm54_vm0, %v353_v21  ;;  %v354_v24 = vadd.f32 %v352_v23, %v350_v22 }
 0x3fc   :  { %356 = vst.msk [vmem:[%s590_s7 + $0x8] sm:$0xff] %vm54_vm0, %v354_v24 }

</bundles_post_ra>
